<compile_context>
chip_gen: v7x
topology: tpu7x:2x2x1
jax: 0.10.0
libtpu: 0.0.40
codegen_flags: <defaults>
</compile_context>

<pallas_src>
import jax
import jax.numpy as jnp
from jax.experimental import pallas as pl
from jax.experimental.pallas import tpu as pltpu

LANE = 128  # TPU lane width: hidden feature dim is padded to this for lane-dense math.


def _mlp_kernel(x_ref, w1_ref, b1_ref, w2_ref, b2_ref, w3_ref, b3_ref, o_ref):
    x = x_ref[...]  # (B, in_f) — unpadded

    # hidden_layer1: Linear + Tanh. w1 is (in_f, out_p); padded output lanes have
    # zero weights/bias, so they stay tanh(0) == 0 through the whole network.
    h = jnp.tanh(
        jnp.dot(x, w1_ref[...], preferred_element_type=jnp.float32) + b1_ref[...]
    )

    # hidden_layer2 applied three times (shared weights). Hoist the loads and
    # pre-broadcast the bias once.
    w2 = w2_ref[...]
    b2 = jnp.broadcast_to(b2_ref[...], h.shape)
    for _ in range(3):
        h = jnp.tanh(jnp.dot(h, w2, preferred_element_type=jnp.float32) + b2)

    # hidden_layer3: Linear + Softmax(last dim). w3 is (out_p, out_f): the output
    # dim stays at its real width, so no padded-lane masking is needed.
    logits = (
        jnp.dot(h, w3_ref[...], preferred_element_type=jnp.float32) + b3_ref[...]
    )
    # No max-subtraction: tanh bounds |h| <= 1, so logits are small and exp is safe.
    e = jnp.exp(logits)
    denom = jnp.sum(e, axis=-1, keepdims=True)
    o_ref[...] = e / denom  # exact divide: rows sum to 1 to f32 rounding


def pad_params(w1, b1, w2, b2, w3, b3):
    """Pad the hidden feature dim to the 128-lane width ONCE (call at init, not
    per forward step). x and the final output dim are left unpadded."""
    in_f, out_f = w1.shape
    out_p = max(LANE, pl.cdiv(out_f, LANE) * LANE)
    pad_c = out_p - out_f
    w1p = jnp.pad(w1, ((0, 0), (0, pad_c)))      # (in_f, out_p)
    b1p = jnp.pad(b1, ((0, 0), (0, pad_c)))      # (1, out_p)
    w2p = jnp.pad(w2, ((0, pad_c), (0, pad_c)))  # (out_p, out_p)
    b2p = jnp.pad(b2, ((0, 0), (0, pad_c)))      # (1, out_p)
    w3p = jnp.pad(w3, ((0, pad_c), (0, 0)))      # (out_p, out_f) — output dim real width
    return w1p, b1p, w2p, b2p, w3p, b3           # b3 stays (1, out_f)


@jax.jit
def net_forward(x, w1p, b1p, w2p, b2p, w3p, b3):
    B, in_f = x.shape
    out_p = w1p.shape[1]
    out_f = w3p.shape[1]

    flops = 2 * B * (in_f * out_p + 3 * out_p * out_p + out_p * out_f)
    transcendentals = B * (4 * out_p + out_f)  # 4 tanh layers + final exp
    bytes_accessed = 4 * (
        x.size + w1p.size + b1p.size + w2p.size + b2p.size + w3p.size + b3.size
        + B * out_f
    )

    # Single invocation (no grid): the whole ~200 KiB problem is VMEM-resident,
    # each array DMA'd exactly once as a whole-array block.
    vmem_spec = pl.BlockSpec(memory_space=pltpu.MemorySpace.VMEM)
    return pl.pallas_call(
        _mlp_kernel,
        out_shape=jax.ShapeDtypeStruct((B, out_f), jnp.float32),
        in_specs=[vmem_spec] * 7,
        out_specs=vmem_spec,
        cost_estimate=pl.CostEstimate(
            flops=flops,
            transcendentals=transcendentals,
            bytes_accessed=bytes_accessed,
        ),
    )(x, w1p, b1p, w2p, b2p, w3p, b3)


def _init_linear(key, fan_in, fan_out):
    # Mimic PyTorch nn.Linear default init: U(-1/sqrt(fan_in), 1/sqrt(fan_in)).
    kw, kb = jax.random.split(key)
    bound = 1.0 / jnp.sqrt(jnp.float32(fan_in))
    # Stored as (in, out) so the kernel does x @ W (PyTorch stores (out, in)).
    w = jax.random.uniform(kw, (fan_in, fan_out), jnp.float32, -bound, bound)
    b = jax.random.uniform(kb, (1, fan_out), jnp.float32, -bound, bound)
    return w, b


def _reference(x, w1, b1, w2, b2, w3, b3):
    h = jnp.tanh(x @ w1 + b1)
    for _ in range(3):
        h = jnp.tanh(h @ w2 + b2)
    return jax.nn.softmax(h @ w3 + b3, axis=-1)


if __name__ == "__main__":
    IN_FEATURES = 32
    OUT_FEATURES = 32
    BATCH = 16

    key = jax.random.PRNGKey(0)
    kx, k1, k2, k3 = jax.random.split(key, 4)

    x = jax.random.normal(kx, (BATCH, IN_FEATURES), jnp.float32)
    w1, b1 = _init_linear(k1, IN_FEATURES, OUT_FEATURES)
    w2, b2 = _init_linear(k2, OUT_FEATURES, OUT_FEATURES)
    w3, b3 = _init_linear(k3, OUT_FEATURES, OUT_FEATURES)

    # Pad constant parameters exactly once (not inside the per-call forward).
    padded = pad_params(w1, b1, w2, b2, w3, b3)

    out = net_forward(x, *padded)
    out = jax.block_until_ready(out)

    ref = _reference(x, w1, b1, w2, b2, w3, b3)
    assert out.shape == (BATCH, OUT_FEATURES)
    assert jnp.allclose(out, ref, atol=1e-4, rtol=1e-4), "mismatch vs. JAX reference"
    assert jnp.allclose(jnp.sum(out, axis=-1), 1.0, atol=1e-5), "softmax rows must sum to 1"

    print("KERNEL_OK")
</pallas_src>

<mosaic_0001>
module attributes {stable_mosaic.version = 11 : i64} {
  func.func @_mlp_kernel(%arg0: memref<16x32xf32, #tpu.memory_space<vmem>>, %arg1: memref<32x128xf32, #tpu.memory_space<vmem>>, %arg2: memref<1x128xf32, #tpu.memory_space<vmem>>, %arg3: memref<128x128xf32, #tpu.memory_space<vmem>>, %arg4: memref<1x128xf32, #tpu.memory_space<vmem>>, %arg5: memref<128x32xf32, #tpu.memory_space<vmem>>, %arg6: memref<1x32xf32, #tpu.memory_space<vmem>>, %arg7: memref<16x32xf32, #tpu.memory_space<vmem>>) attributes {dimension_semantics = [], scalar_prefetch = 0 : i64, scratch_operands = 0 : i64, tpu.core_type = #tpu.core_type<tc>} {
    %c0 = arith.constant 0 : index
    %c0_0 = arith.constant 0 : index
    %0 = vector.load %arg0[%c0, %c0_0] : memref<16x32xf32, #tpu.memory_space<vmem>>, vector<16x32xf32>
    %c0_1 = arith.constant 0 : index
    %c0_2 = arith.constant 0 : index
    %1 = vector.load %arg1[%c0_1, %c0_2] : memref<32x128xf32, #tpu.memory_space<vmem>>, vector<32x128xf32>
    %cst = arith.constant dense<0.000000e+00> : vector<16x128xf32>
    %2 = tpu.matmul %0, %1, %cst {dimension_numbers = #tpu.dot_dimension_numbers<[1], [0], [0], [1], [0, 0, 1, 1], [], []>} : vector<16x32xf32>, vector<32x128xf32>, vector<16x128xf32> -> vector<16x128xf32>
    %c0_3 = arith.constant 0 : index
    %c0_4 = arith.constant 0 : index
    %3 = vector.load %arg2[%c0_3, %c0_4] : memref<1x128xf32, #tpu.memory_space<vmem>>, vector<1x128xf32>
    %4 = vector.broadcast %3 : vector<1x128xf32> to vector<16x128xf32>
    %5 = arith.addf %2, %4 : vector<16x128xf32>
    %6 = math.tanh %5 : vector<16x128xf32>
    %c0_5 = arith.constant 0 : index
    %c0_6 = arith.constant 0 : index
    %7 = vector.load %arg3[%c0_5, %c0_6] : memref<128x128xf32, #tpu.memory_space<vmem>>, vector<128x128xf32>
    %c0_7 = arith.constant 0 : index
    %c0_8 = arith.constant 0 : index
    %8 = vector.load %arg4[%c0_7, %c0_8] : memref<1x128xf32, #tpu.memory_space<vmem>>, vector<1x128xf32>
    %9 = vector.shape_cast %8 : vector<1x128xf32> to vector<1x128xf32>
    %10 = vector.broadcast %9 : vector<1x128xf32> to vector<16x128xf32>
    %cst_9 = arith.constant dense<0.000000e+00> : vector<16x128xf32>
    %11 = tpu.matmul %6, %7, %cst_9 {dimension_numbers = #tpu.dot_dimension_numbers<[1], [0], [0], [1], [0, 0, 1, 1], [], []>} : vector<16x128xf32>, vector<128x128xf32>, vector<16x128xf32> -> vector<16x128xf32>
    %12 = arith.addf %11, %10 : vector<16x128xf32>
    %13 = math.tanh %12 : vector<16x128xf32>
    %cst_10 = arith.constant dense<0.000000e+00> : vector<16x128xf32>
    %14 = tpu.matmul %13, %7, %cst_10 {dimension_numbers = #tpu.dot_dimension_numbers<[1], [0], [0], [1], [0, 0, 1, 1], [], []>} : vector<16x128xf32>, vector<128x128xf32>, vector<16x128xf32> -> vector<16x128xf32>
    %15 = arith.addf %14, %10 : vector<16x128xf32>
    %16 = math.tanh %15 : vector<16x128xf32>
    %cst_11 = arith.constant dense<0.000000e+00> : vector<16x128xf32>
    %17 = tpu.matmul %16, %7, %cst_11 {dimension_numbers = #tpu.dot_dimension_numbers<[1], [0], [0], [1], [0, 0, 1, 1], [], []>} : vector<16x128xf32>, vector<128x128xf32>, vector<16x128xf32> -> vector<16x128xf32>
    %18 = arith.addf %17, %10 : vector<16x128xf32>
    %19 = math.tanh %18 : vector<16x128xf32>
    %c0_12 = arith.constant 0 : index
    %c0_13 = arith.constant 0 : index
    %20 = vector.load %arg5[%c0_12, %c0_13] : memref<128x32xf32, #tpu.memory_space<vmem>>, vector<128x32xf32>
    %cst_14 = arith.constant dense<0.000000e+00> : vector<16x32xf32>
    %21 = tpu.matmul %19, %20, %cst_14 {dimension_numbers = #tpu.dot_dimension_numbers<[1], [0], [0], [1], [0, 0, 1, 1], [], []>} : vector<16x128xf32>, vector<128x32xf32>, vector<16x32xf32> -> vector<16x32xf32>
    %c0_15 = arith.constant 0 : index
    %c0_16 = arith.constant 0 : index
    %22 = vector.load %arg6[%c0_15, %c0_16] : memref<1x32xf32, #tpu.memory_space<vmem>>, vector<1x32xf32>
    %23 = vector.broadcast %22 : vector<1x32xf32> to vector<16x32xf32>
    %24 = arith.addf %21, %23 : vector<16x32xf32>
    %25 = math.exp %24 : vector<16x32xf32>
    %cst_17 = arith.constant dense<0.000000e+00> : vector<16xf32>
    %26 = vector.multi_reduction <add>, %25, %cst_17 [1] : vector<16x32xf32> to vector<16xf32>
    %27 = vector.shape_cast %26 : vector<16xf32> to vector<16x1xf32>
    %28 = vector.broadcast %27 : vector<16x1xf32> to vector<16x32xf32>
    %29 = arith.divf %25, %28 : vector<16x32xf32>
    %c0_18 = arith.constant 0 : index
    %c0_19 = arith.constant 0 : index
    %30 = vector.load %arg7[%c0_18, %c0_19] : memref<16x32xf32, #tpu.memory_space<vmem>>, vector<16x32xf32>
    tpu.vector_store %arg7[%c0_18, %c0_19], %29 {strides = array<i32>} : memref<16x32xf32, #tpu.memory_space<vmem>>, vector<16x32xf32>,
    return
  }
}

</mosaic_0001>

<bundles_post_ra>
// kernel: net_forward.1
= control target key start
LH: loop header
LB: loop body
LE: loop exit
PB: predicated region body
PF: predicated region fallthrough
CT: control target
= control target key end

     0   :  { %12 = vsyncpa [#allocation3], 0  ;;  %s1198_s0 = inlined_call_operand.hbm [shape: f32[16,32], index: 0, kind: input, shape index: {}]   ;;  %s1199_s1 = inlined_call_operand.vmem [shape: f32[32,128], index: 1, kind: input, shape index: {}]   ;;  %s1200_s2 = inlined_call_operand.vmem [shape: f32[1,128], index: 2, kind: input, shape index: {}]   ;;  %s1201_s3 = inlined_call_operand.vmem [shape: f32[128,128], index: 3, kind: input, shape index: {}]   ;;  %s1202_s4 = inlined_call_operand.vmem [shape: f32[1,128], index: 4, kind: input, shape index: {}]   ;;  %s1203_s5 = inlined_call_operand.vmem [shape: f32[128,32], index: 5, kind: input, shape index: {}]   ;;  %s1204_s6 = inlined_call_operand.vmem [shape: f32[1,32], index: 6, kind: input, shape index: {}]   ;;  %s1205_s7 = inlined_call_operand.hbm [shape: f32[16,32], index: 7, kind: output, shape index: {}]  }
   0x1   :  { %13 = vsyncpa [#allocation4], 0  ;;  %s969_s24 = smov [#allocation2]   ;;  %s921_s28 = scalar_lea.hbm %s1198_s0, 256 }
   0x2   :  { %s19_s25 = sshll.u32 %s969_s24, 4  ;;  %p922_p0 = scmp.ne.s32.totalorder %s1198_s0, %s921_s28  ;;  %s20_s25 = int_to_ptr.vmem [resolvable:$true] %s19_s25 }
   0x3   :  { %p925_p1 = scmp.lt.u32.totalorder %s921_s28, %s1198_s0 }
   0x5   :  { %p927_p2 = pnand %p925_p1, %p922_p0 }
   0x7   :  { %930 = shalt.err (!%p927_p2)
}
   0x8   :  { %s931_s10 = scalar_lea.vmem %s20_s25, 256  ;;  %p936_p4 = scmp.lt.s32.totalorder %s20_s25, %s20_s25 }
   0x9   :  { %p932_p3 = scmp.ne.s32.totalorder %s20_s25, %s931_s10  ;;  %p937_p5 = scmp.lt.s32.totalorder %s931_s10, %s931_s10 }
   0xb   :  { %p938_p6 = por %p937_p5, %p936_p4 }
   0xd   :  { %p939_p7 = pnand %p938_p6, %p932_p3 }
   0xf   :  { %942 = shalt.err (!%p939_p7)
}
  0x10   :  { %s970_s11 = smov 128   ;;  %s971_s12 = smov 8  }
  0x11   :  { %25 = dma.hbm_to_vmem [thread:$0]  %s1198_s0, 256, %s20_s25, [#allocation3], %s970_s11, %s970_s11, %s971_s12  }
  0x12   :  { %965 = dma.done.wait [#allocation3], 256  }
  0x13   :  { %966 = vsyncadd [#allocation3], 4294967040  ;;  %vm54_vm0 = vcmask 261120   ;;  %v43_v0 = vld [vmem:[%s1199_s1] sm:$0xff]  ;;  %v44_v1 = vld [vmem:[%s1199_s1 + $0x8] sm:$0xff] }
  0x14   :  { %v45_v2 = vld [vmem:[%s1199_s1 + $0x10] sm:$0xff]  ;;  %v757_v3 = vpack.c.bf16 %v44_v1, %v43_v0  ;;  %v46_v4 = vld [vmem:[%s1199_s1 + $0x18] sm:$0xff]  ;;  %v41_v5 = vld [vmem:[#allocation2] sm:$0xff] }
  0x15   :  { %v761_v6 = vpack.c.bf16 %v46_v4, %v45_v2  ;;  %614 = vmatprep.mubr.msk.f32.mxu0 %vm54_vm0, %v41_v5  ;;  %v138_v7 = vld [vmem:[%s1201_s3] sm:$0xff]  ;;  %v139_v8 = vld [vmem:[%s1201_s3 + $0x8] sm:$0xff]  ;;  %v140_v9 = vld [vmem:[%s1201_s3 + $0x10] sm:$0xff] }
  0x16   :  { %758 = vmatprep.subr.bf16.mxu0 %v757_v3  ;;  %v1050_v10 = vpack.c.bf16 %v139_v8, %v138_v7  ;;  %v141_v11 = vld [vmem:[%s1201_s3 + $0x18] sm:$0xff]  ;;  %v142_v13 = vld [vmem:[%s1201_s3 + $0x20] sm:$0xff]  ;;  %v143_v14 = vld [vmem:[%s1201_s3 + $0x28] sm:$0xff] }
  0x17   :  { %760 = vmatpush3.bf16.msra.mxu0 %v757_v3  ;;  %v1055_v12 = vpack.c.bf16 %v141_v11, %v140_v9  ;;  %v1066_v15 = vpack.c.bf16 %v143_v14, %v142_v13  ;;  %v42_v16 = vld [vmem:[#allocation2 + $0x8] sm:$0xff]  ;;  %v144_v17 = vld [vmem:[%s1201_s3 + $0x30] sm:$0xff]  ;;  %v145_v18 = vld [vmem:[%s1201_s3 + $0x38] sm:$0xff] }
  0x18   :  { %762 = vmatprep.subr.bf16.mxu0 %v761_v6  ;;  %766 = vmatprep.subr.bf16.mxu1 %v1050_v10  ;;  %v777_v19 = vpack.c.bf16 %v145_v18, %v144_v17  ;;  %v146_v20 = vld [vmem:[%s1201_s3 + $0x40] sm:$0xff]  ;;  %v147_v21 = vld [vmem:[%s1201_s3 + $0x48] sm:$0xff]  ;;  %v148_v23 = vld [vmem:[%s1201_s3 + $0x50] sm:$0xff] }
  0x19   :  { %768 = vmatpush3.bf16.msra.mxu1 %v1050_v10  ;;  %v781_v22 = vpack.c.bf16 %v147_v21, %v146_v20  ;;  %v149_v24 = vld [vmem:[%s1201_s3 + $0x58] sm:$0xff]  ;;  %v150_v26 = vld [vmem:[%s1201_s3 + $0x60] sm:$0xff]  ;;  %v151_v27 = vld [vmem:[%s1201_s3 + $0x68] sm:$0xff] }
  0x1a   :  { %770 = vmatprep.subr.bf16.mxu1 %v1055_v12  ;;  %v785_v25 = vpack.c.bf16 %v149_v24, %v148_v23  ;;  %v152_v28 = vld [vmem:[%s1201_s3 + $0x70] sm:$0xff]  ;;  %v789_v29 = vpack.c.bf16 %v151_v27, %v150_v26  ;;  %v153_v30 = vld [vmem:[%s1201_s3 + $0x78] sm:$0xff]  ;;  %v523_v32 = vld [vmem:[%s1200_s2] ss:$0 sm:$0xff] }
  0x1b   :  { %764 = vmatpush3.bf16.msra.mxu0 %v761_v6  ;;  %v793_v31 = vpack.c.bf16 %v153_v30, %v152_v28  ;;  %v1120_v39 = vld [vmem:[%s1202_s4] ss:$0 sm:$0xff]  ;;  %v393_v47 = vld [vmem:[%s1203_s5 + $0x8] sm:$0xff]  ;;  %v394_v48 = vld [vmem:[%s1203_s5 + $0x10] sm:$0xff] }
  0x1c   :  { %798 = vmatprep.subr.bf16.mxu0 %v1050_v10  ;;  %v392_v46 = vld [vmem:[%s1203_s5] sm:$0xff]  ;;  %v395_v50 = vld [vmem:[%s1203_s5 + $0x18] sm:$0xff]  ;;  %v397_v53 = vld [vmem:[%s1203_s5 + $0x28] sm:$0xff] }
  0x1d   :  { %772 = vmatpush3.bf16.msra.mxu1 %v1055_v12  ;;  %v861_v49 = vpack.c.bf16 %v393_v47, %v392_v46  ;;  %v865_v51 = vpack.c.bf16 %v395_v50, %v394_v48  ;;  %v396_v52 = vld [vmem:[%s1203_s5 + $0x20] sm:$0xff]  ;;  %v398_v55 = vld [vmem:[%s1203_s5 + $0x30] sm:$0xff]  ;;  %v399_v56 = vld [vmem:[%s1203_s5 + $0x38] sm:$0xff] }
  0x1e   :  { %615 = vmatmul.mubr.msk.f32.vlgmr.msra.gmra.mrb[0].mxu0 %vm54_vm0, %v42_v16  ;;  %774 = vmatprep.subr.bf16.mxu1 %v1066_v15  ;;  %v869_v54 = vpack.c.bf16 %v397_v53, %v396_v52  ;;  %v873_v57 = vpack.c.bf16 %v399_v56, %v398_v55  ;;  %v400_v0 = vld [vmem:[%s1203_s5 + $0x40] sm:$0xff]  ;;  %v401_v1 = vld [vmem:[%s1203_s5 + $0x48] sm:$0xff]  ;;  %v402_v3 = vld [vmem:[%s1203_s5 + $0x50] sm:$0xff] }
  0x1f   :  { %800 = vmatpush3.bf16.msra.mxu0 %v1050_v10  ;;  %v877_v2 = vpack.c.bf16 %v401_v1, %v400_v0  ;;  %v403_v4 = vld [vmem:[%s1203_s5 + $0x58] sm:$0xff]  ;;  %v404_v6 = vld [vmem:[%s1203_s5 + $0x60] sm:$0xff]  ;;  %v405_v7 = vld [vmem:[%s1203_s5 + $0x68] sm:$0xff] }
  0x20   :  { %802 = vmatprep.subr.bf16.mxu0 %v1055_v12  ;;  %v881_v5 = vpack.c.bf16 %v403_v4, %v402_v3  ;;  %v406_v8 = vld [vmem:[%s1203_s5 + $0x70] sm:$0xff]  ;;  %v885_v9 = vpack.c.bf16 %v405_v7, %v404_v6  ;;  %v527_v18 = vld [vmem:[%s1204_s6] ss:$0 sm:$0xff] }
  0x21   :  { %776 = vmatpush3.bf16.msra.mxu1 %v1066_v15 }
  0x22   :  { %778 = vmatprep.subr.bf16.mxu1 %v777_v19 }
  0x23   :  { %804 = vmatpush3.bf16.msra.mxu0 %v1055_v12 }
  0x24   :  { %806 = vmatprep.subr.bf16.mxu0 %v1066_v15 }
  0x25   :  { %780 = vmatpush3.bf16.msra.mxu1 %v777_v19 }
  0x26   :  { %782 = vmatprep.subr.bf16.mxu1 %v781_v22 }
  0x27   :  { %808 = vmatpush3.bf16.msra.mxu0 %v1066_v15 }
  0x28   :  { %810 = vmatprep.subr.bf16.mxu0 %v777_v19 }
  0x29   :  { %784 = vmatpush3.bf16.msra.mxu1 %v781_v22 }
  0x2a   :  { %786 = vmatprep.subr.bf16.mxu1 %v785_v25 }
  0x2b   :  { %812 = vmatpush3.bf16.msra.mxu0 %v777_v19 }
  0x2c   :  { %814 = vmatprep.subr.bf16.mxu0 %v781_v22 }
  0x2d   :  { %788 = vmatpush3.bf16.msra.mxu1 %v785_v25 }
  0x2e   :  { %790 = vmatprep.subr.bf16.mxu1 %v789_v29 }
  0x2f   :  { %816 = vmatpush3.bf16.msra.mxu0 %v781_v22 }
  0x30   :  { %818 = vmatprep.subr.bf16.mxu0 %v785_v25 }
  0x31   :  { %792 = vmatpush3.bf16.msra.mxu1 %v789_v29 }
  0x32   :  { %794 = vmatprep.subr.bf16.mxu1 %v793_v31 }
  0x33   :  { %820 = vmatpush3.bf16.msra.mxu0 %v785_v25 }
  0x34   :  { %822 = vmatprep.subr.bf16.mxu0 %v789_v29 }
  0x35   :  { %796 = vmatpush3.bf16.msra.mxu1 %v793_v31 }
  0x36   :  { %830 = vmatprep.subr.bf16.mxu1 %v1050_v10 }
  0x37   :  { %824 = vmatpush3.bf16.msra.mxu0 %v789_v29 }
  0x38   :  { %826 = vmatprep.subr.bf16.mxu0 %v793_v31 }
  0x3b   :  { %828 = vmatpush3.bf16.msra.mxu0 %v793_v31 }
  0x3c   :  { %862 = vmatprep.subr.bf16.mxu0 %v861_v49 }
  0xf1   :  { %v616_v33 = vpop.f32.mrb[0].mxu0 }
  0xf2   :  { %v133_v34 = vadd.f32 %v616_v33, %v523_v32  ;;  %v127_v35 = vpop.f32.mrb[1].mxu0 }
  0xf3   :  { %v128_v36 = vadd.f32 %v523_v32, %v127_v35 }
  0xf5   :  { %897 = vtanh.f32 %v128_v36 }
  0xf6   :  { %899 = vtanh.f32 %v133_v34 }
  0xff   :  { %v898_v37 = vpop.eup %897 }
 0x100   :  { %v900_v38 = vpop.eup %899  ;;  %649 = vmatprep.mubr.f32.mxu1 %v898_v37 }
 0x101   :  { %650 = vmatmul.mubr.f32.vlgmr.msra.gmra.mrb[0].mxu1 %v900_v38 }
 0x102   :  { %832 = vmatpush3.bf16.msra.mxu1 %v1050_v10  ;;  %v407_v10 = vld [vmem:[%s1203_s5 + $0x78] sm:$0xff]  ;;  %s972_s5 = smov [#allocation5]  }
 0x103   :  { %834 = vmatprep.subr.bf16.mxu1 %v1055_v12  ;;  %v889_v11 = vpack.c.bf16 %v407_v10, %v406_v8  ;;  %s511_s6 = sshll.u32 %s972_s5, 4  ;;  %s512_s6 = int_to_ptr.vmem [resolvable:$true] %s511_s6 }
 0x104   :  { %s943_s18 = scalar_lea.vmem %s512_s6, 256  ;;  %p948_p9 = scmp.lt.s32.totalorder %s512_s6, %s512_s6 }
 0x105   :  { %p944_p8 = scmp.ne.s32.totalorder %s512_s6, %s943_s18  ;;  %p949_p10 = scmp.lt.s32.totalorder %s943_s18, %s943_s18 }
 0x106   :  { %836 = vmatpush3.bf16.msra.mxu1 %v1055_v12 }
 0x107   :  { %838 = vmatprep.subr.bf16.mxu1 %v1066_v15  ;;  %p950_p11 = por %p949_p10, %p948_p9 }
 0x109   :  { %p951_p12 = pnand %p950_p11, %p944_p8 }
 0x10a   :  { %840 = vmatpush3.bf16.msra.mxu1 %v1066_v15 }
 0x10b   :  { %842 = vmatprep.subr.bf16.mxu1 %v777_v19 }
 0x10e   :  { %844 = vmatpush3.bf16.msra.mxu1 %v777_v19 }
 0x10f   :  { %846 = vmatprep.subr.bf16.mxu1 %v781_v22 }
 0x112   :  { %848 = vmatpush3.bf16.msra.mxu1 %v781_v22 }
 0x113   :  { %850 = vmatprep.subr.bf16.mxu1 %v785_v25 }
 0x116   :  { %852 = vmatpush3.bf16.msra.mxu1 %v785_v25 }
 0x117   :  { %854 = vmatprep.subr.bf16.mxu1 %v789_v29 }
 0x11a   :  { %856 = vmatpush3.bf16.msra.mxu1 %v789_v29 }
 0x11b   :  { %858 = vmatprep.subr.bf16.mxu1 %v793_v31 }
 0x11e   :  { %860 = vmatpush3.bf16.msra.mxu1 %v793_v31 }
 0x1d4   :  { %v651_v40 = vpop.f32.mrb[0].mxu1 }
 0x1d5   :  { %v233_v41 = vadd.f32 %v651_v40, %v1120_v39  ;;  %v227_v42 = vpop.f32.mrb[1].mxu1 }
 0x1d6   :  { %v228_v43 = vadd.f32 %v1120_v39, %v227_v42 }
 0x1d8   :  { %901 = vtanh.f32 %v228_v43 }
 0x1d9   :  { %903 = vtanh.f32 %v233_v41 }
 0x1e2   :  { %v902_v44 = vpop.eup %901 }
 0x1e3   :  { %v904_v45 = vpop.eup %903  ;;  %684 = vmatprep.mubr.f32.mxu0 %v902_v44 }
 0x1e4   :  { %685 = vmatmul.mubr.f32.vlgmr.msra.gmra.mrb[2].mxu0 %v904_v45 }
 0x1e5   :  { %864 = vmatpush3.bf16.msra.mxu0 %v861_v49 }
 0x1e6   :  { %866 = vmatprep.subr.bf16.mxu0 %v865_v51 }
 0x1e9   :  { %868 = vmatpush3.bf16.msra.mxu0 %v865_v51 }
 0x1ea   :  { %870 = vmatprep.subr.bf16.mxu0 %v869_v54 }
 0x1ed   :  { %872 = vmatpush3.bf16.msra.mxu0 %v869_v54 }
 0x1ee   :  { %874 = vmatprep.subr.bf16.mxu0 %v873_v57 }
 0x1f1   :  { %876 = vmatpush3.bf16.msra.mxu0 %v873_v57 }
 0x1f2   :  { %878 = vmatprep.subr.bf16.mxu0 %v877_v2 }
 0x1f5   :  { %880 = vmatpush3.bf16.msra.mxu0 %v877_v2 }
 0x1f6   :  { %882 = vmatprep.subr.bf16.mxu0 %v881_v5 }
 0x1f9   :  { %884 = vmatpush3.bf16.msra.mxu0 %v881_v5 }
 0x1fa   :  { %886 = vmatprep.subr.bf16.mxu0 %v885_v9 }
 0x1fd   :  { %888 = vmatpush3.bf16.msra.mxu0 %v885_v9 }
 0x1fe   :  { %890 = vmatprep.subr.bf16.mxu0 %v889_v11 }
 0x201   :  { %892 = vmatpush3.bf16.msra.mxu0 %v889_v11 }
 0x2b7   :  { %v686_v58 = vpop.f32.mrb[2].mxu0 }
 0x2b8   :  { %v310_v59 = vadd.f32 %v686_v58, %v1120_v39  ;;  %v304_v60 = vpop.f32.mrb[3].mxu0 }
 0x2b9   :  { %v305_v61 = vadd.f32 %v1120_v39, %v304_v60 }
 0x2bb   :  { %905 = vtanh.f32 %v305_v61 }
 0x2bc   :  { %907 = vtanh.f32 %v310_v59 }
 0x2c5   :  { %v906_v62 = vpop.eup %905 }
 0x2c6   :  { %v908_v63 = vpop.eup %907  ;;  %719 = vmatprep.mubr.f32.mxu1 %v906_v62 }
 0x2c7   :  { %720 = vmatmul.mubr.f32.vlgmr.msra.gmra.mrb[2].mxu1 %v908_v63 }
 0x39a   :  { %v721_v12 = vpop.f32.mrb[2].mxu1 }
 0x39b   :  { %v387_v13 = vadd.f32 %v721_v12, %v1120_v39  ;;  %v381_v14 = vpop.f32.mrb[3].mxu1 }
 0x39c   :  { %v382_v15 = vadd.f32 %v1120_v39, %v381_v14 }
 0x39e   :  { %909 = vtanh.f32 %v382_v15 }
 0x39f   :  { %911 = vtanh.f32 %v387_v13 }
 0x3a8   :  { %v910_v16 = vpop.eup %909 }
 0x3a9   :  { %v912_v17 = vpop.eup %911  ;;  %754 = vmatprep.mubr.f32.mxu0 %v910_v16 }
 0x3aa   :  { %755 = vmatmul.mubr.f32.vlgmr.msra.gmra.mrb[4].mxu0 %v912_v17 }
 0x47d   :  { %v756_v19 = vpop.f32.mrb[4].mxu0 }
 0x47e   :  { %v487_v20 = vadd.f32 %v756_v19, %v527_v18  ;;  %v481_v21 = vpop.f32.mrb[5].mxu0 }
 0x47f   :  { %v482_v22 = vadd.f32 %v527_v18, %v481_v21 }
 0x480   :  { %v492_v23 = vmul.f32 1.442695, %v487_v20 }
 0x481   :  { %v490_v24 = vmul.f32 1.442695, %v482_v22 }
 0x483   :  { %913 = vpow2.f32 %v490_v24 }
 0x484   :  { %915 = vpow2.f32 %v492_v23 }
 0x48d   :  { %v914_v25 = vpop.eup %913 }
 0x48e   :  { %v494_v26 = vsel %vm54_vm0, %v914_v25, 0.0  ;;  %v916_v27 = vpop.eup %915 }
 0x48f   :  { %495 = vadd.xlane.f32.xlu0 %v494_v26  ;;  %v497_v28 = vsel %vm54_vm0, %v916_v27, 0.0 }
 0x493   :  { %498 = vadd.xlane.f32.xlu0 %v497_v28 }
 0x51c   :  { %v496_v29 = vpop.xlane.xlu0 %495 }
 0x51d   :  { %917 = vrcp.f32 %v496_v29 }
 0x520   :  { %v499_v30 = vpop.xlane.xlu0 %498 }
 0x521   :  { %919 = vrcp.f32 %v499_v30 }
 0x527   :  { %v918_v31 = vpop.eup %917 }
 0x528   :  { %v501_v32 = vmul.f32 %v918_v31, %v914_v25 }
 0x52a   :  { %504 = vst.msk [vmem:[#allocation5] sm:$0xff] %vm54_vm0, %v501_v32 }
 0x52b   :  { %v920_v33 = vpop.eup %919 }
 0x52c   :  { %v503_v34 = vmul.f32 %v920_v33, %v916_v27 }
 0x52e   :  { %505 = vst.msk [vmem:[#allocation5 + $0x8] sm:$0xff] %vm54_vm0, %v503_v34 }
 0x52f   :  { %954 = shalt.err (!%p951_p12)
}
 0x530   :  { %s955_s21 = scalar_lea.hbm %s1205_s7, 256 }
 0x531   :  { %p956_p13 = scmp.ne.s32.totalorder %s1205_s7, %s955_s21  ;;  %p959_p0 = scmp.lt.u32.totalorder %s955_s21, %s1205_s7 }
 0x533   :  { %p961_p1 = pnand %p959_p0, %p956_p13 }
 0x535   :  { %964 = shalt.err (!%p961_p1)
}
 0x536   :  { %517 = dma.vmem_to_hbm [thread:$0]  %s512_s6, 256, %s1205_s7, [#allocation4], %s970_s11, %s970_s11, %s971_s12  }
 0x537   :  { %967 = dma.done.wait [#allocation4], 256  }
 0x538   :  { %968 = vsyncadd [#allocation4], 4294967040 }
 0x539   :  { %521 = vsyncpa [#allocation3], 1 }
 0x53a   :  { %522 = vsyncpa [#allocation4], 1 }

</bundles_post_ra>
